<compile_context>
chip_gen: v6e
topology: v6e:2x2x1
jax: 0.10.0
libtpu: 0.0.40
codegen_flags: <defaults>
</compile_context>

<pallas_src>
import functools

import jax
import jax.numpy as jnp
from jax.experimental import pallas as pl
from jax.experimental.pallas import tpu as pltpu


def se_block_kernel(x_ref, w1_ref, b1_ref, w2_ref, b2_ref, o_ref, acc_ref,
                    *, inv_hw):
    k = pl.program_id(1)

    # --- init accumulator at the start of each batch-tile's reduction ---
    @pl.when(k == 0)
    def _init():
        acc_ref[...] = jnp.zeros_like(acc_ref)

    # --- accumulate: f32 partial sum of this spatial chunk ---
    # (upcast per-chunk; bf16 inputs stay narrow on the wire)
    acc_ref[...] += jnp.sum(x_ref[...].astype(jnp.float32), axis=-1)

    # --- finalize: mean + excitation MLP, only on the last chunk ---
    @pl.when(k == pl.num_programs(1) - 1)
    def _finalize():
        s = acc_ref[...] * inv_hw                        # (TN, C) mean pool
        h = jnp.dot(s, w1_ref[...], preferred_element_type=jnp.float32)
        h = h + b1_ref[...]
        h = h * jax.nn.sigmoid(h)                        # Swish
        e = jnp.dot(h, w2_ref[...], preferred_element_type=jnp.float32)
        e = e + b2_ref[...]
        o_ref[...] = jax.nn.sigmoid(e).astype(o_ref.dtype)


def se_block(x, w1, b1, w2, b2, *, spatial_chunk=512):
    """x: (N, C, H, W) -> (N, C, 1, 1) excitation gates."""
    assert spatial_chunk % 128 == 0, "spatial_chunk must be a multiple of 128"
    N, C, H, W = x.shape
    hidden = w1.shape[1]
    HW = H * W

    # Lane-dense layout: (N, C, H*W). Free view for contiguous NCHW.
    xr = x.reshape(N, C, HW)

    # Choose the spatial chunk. If the whole spatial extent is small, take it
    # in one chunk (block dim == full dim satisfies the (8,128) rule); else
    # stream in 128-aligned chunks, zero-padding the tail (zeros do not
    # change the running SUM; we divide by the true H*W at finalize).
    if HW <= spatial_chunk:
        chunk = HW
        hw_pad = HW
    else:
        chunk = spatial_chunk
        hw_pad = ((HW + chunk - 1) // chunk) * chunk
        if hw_pad != HW:
            xr = jnp.pad(xr, ((0, 0), (0, 0), (0, hw_pad - HW)))
    num_k = hw_pad // chunk

    # Batch tiling: sublane-friendly tiles of 8 when they divide evenly,
    # otherwise the whole batch in one tile (block dim == full dim is legal).
    tn = 8 if (N % 8 == 0) else N
    num_n = N // tn

    kernel = functools.partial(se_block_kernel, inv_hw=1.0 / float(HW))

    itemsize = jnp.dtype(x.dtype).itemsize
    cost = pl.CostEstimate(
        flops=2 * N * C * HW + 2 * N * C * hidden * 2,
        transcendentals=N * (hidden + 2 * C),
        bytes_accessed=N * C * HW * itemsize
        + (w1.size + b1.size + w2.size + b2.size) * 4
        + N * C * itemsize,
    )

    out = pl.pallas_call(
        kernel,
        out_shape=jax.ShapeDtypeStruct((N, C), x.dtype),
        grid_spec=pltpu.PrefetchScalarGridSpec(
            num_scalar_prefetch=0,
            grid=(num_n, num_k),            # reduction (spatial) axis LAST
            in_specs=[
                pl.BlockSpec((tn, C, chunk), lambda i, k: (i, 0, k)),
                pl.BlockSpec((C, hidden), lambda i, k: (0, 0)),
                pl.BlockSpec((1, hidden), lambda i, k: (0, 0)),
                pl.BlockSpec((hidden, C), lambda i, k: (0, 0)),
                pl.BlockSpec((1, C), lambda i, k: (0, 0)),
            ],
            out_specs=pl.BlockSpec((tn, C), lambda i, k: (i, 0)),
            scratch_shapes=[pltpu.VMEM((tn, C), jnp.float32)],
        ),
        compiler_params=pltpu.CompilerParams(
            dimension_semantics=("parallel", "arbitrary"),
        ),
        cost_estimate=cost,
    )(xr, w1, b1, w2, b2)

    # reshape gate back to (N, C, 1, 1) like the PyTorch module
    return out.reshape(N, C, 1, 1)


def init_params(key, in_channels, r=4):
    """Deterministic init matching nn.Linear shapes (weights pre-transposed)."""
    hidden = in_channels * r
    k1, k2, k3, k4 = jax.random.split(key, 4)
    # nn.Linear default init: U(-1/sqrt(fan_in), 1/sqrt(fan_in))
    bnd1 = 1.0 / jnp.sqrt(in_channels)
    bnd2 = 1.0 / jnp.sqrt(hidden)
    w1 = jax.random.uniform(k1, (in_channels, hidden), jnp.float32, -bnd1, bnd1)
    b1 = jax.random.uniform(k2, (1, hidden), jnp.float32, -bnd1, bnd1)
    w2 = jax.random.uniform(k3, (hidden, in_channels), jnp.float32, -bnd2, bnd2)
    b2 = jax.random.uniform(k4, (1, in_channels), jnp.float32, -bnd2, bnd2)
    return w1, b1, w2, b2


def se_block_ref(x, w1, b1, w2, b2):
    """Pure-JAX reference for correctness check."""
    s = jnp.mean(x.astype(jnp.float32), axis=(2, 3))
    h = s @ w1 + b1
    h = h * jax.nn.sigmoid(h)
    e = h @ w2 + b2
    g = jax.nn.sigmoid(e)
    return g.reshape(x.shape[0], x.shape[1], 1, 1).astype(x.dtype)


if __name__ == "__main__":
    key = jax.random.PRNGKey(0)
    kx, kp = jax.random.split(key)

    N, C, H, W = 2, 4, 16, 16
    r = 4

    x = jax.random.normal(kx, (N, C, H, W), dtype=jnp.float32)
    w1, b1, w2, b2 = init_params(kp, C, r)

    out = se_block(x, w1, b1, w2, b2)
    out = jax.block_until_ready(out)

    ref = se_block_ref(x, w1, b1, w2, b2)
    assert out.shape == (N, C, 1, 1), out.shape
    assert jnp.allclose(out, ref, atol=1e-5, rtol=1e-5), "mismatch vs reference"

    # also exercise the multi-chunk streaming path (HW > spatial_chunk)
    out2 = jax.block_until_ready(se_block(x, w1, b1, w2, b2, spatial_chunk=128))
    assert jnp.allclose(out2, ref, atol=1e-5, rtol=1e-5), "mismatch (tiled path)"

    print("KERNEL_OK")
</pallas_src>

<mosaic_0001>
module attributes {stable_mosaic.version = 11 : i64} {
  func.func @se_block_kernel(%arg0: i32, %arg1: i32, %arg2: memref<2x4x256xf32, #tpu.memory_space<vmem>>, %arg3: memref<4x16xf32, #tpu.memory_space<vmem>>, %arg4: memref<1x16xf32, #tpu.memory_space<vmem>>, %arg5: memref<16x4xf32, #tpu.memory_space<vmem>>, %arg6: memref<1x4xf32, #tpu.memory_space<vmem>>, %arg7: memref<2x4xf32, #tpu.memory_space<vmem>>, %arg8: memref<2x4xf32, #tpu.memory_space<vmem>>) attributes {dimension_semantics = [#tpu.dimension_semantics<parallel>, #tpu.dimension_semantics<arbitrary>], iteration_bounds = array<i64: 1, 1>, scalar_prefetch = 0 : i64, scratch_operands = 1 : i64, tpu.core_type = #tpu.core_type<tc>, window_params = [{transform_indices = @transform_0, window_bounds = array<i64: 2, 4, 256>}, {pipeline_mode = #tpu.pipeline_mode<synchronous>, transform_indices = @transform_1, window_bounds = array<i64: 4, 16>}, {pipeline_mode = #tpu.pipeline_mode<synchronous>, transform_indices = @transform_2, window_bounds = array<i64: 1, 16>}, {pipeline_mode = #tpu.pipeline_mode<synchronous>, transform_indices = @transform_3, window_bounds = array<i64: 16, 4>}, {pipeline_mode = #tpu.pipeline_mode<synchronous>, transform_indices = @transform_4, window_bounds = array<i64: 1, 4>}, {transform_indices = @transform_5, window_bounds = array<i64: 2, 4>}]} {
    %c0_i32 = arith.constant 0 : i32
    %0 = arith.cmpi eq, %arg1, %c0_i32 : i32
    %1 = arith.extui %0 : i1 to i32
    %c0_i32_0 = arith.constant 0 : i32
    %2 = arith.cmpi ne, %1, %c0_i32_0 : i32
    scf.if %2 {
      %cst_9 = arith.constant 0.000000e+00 : f32
      %11 = vector.broadcast %cst_9 : f32 to vector<2x4xf32>
      %c0_10 = arith.constant 0 : index
      %c0_11 = arith.constant 0 : index
      %12 = vector.load %arg8[%c0_10, %c0_11] : memref<2x4xf32, #tpu.memory_space<vmem>>, vector<2x4xf32>
      tpu.vector_store %arg8[%c0_10, %c0_11], %11 {strides = array<i32>} : memref<2x4xf32, #tpu.memory_space<vmem>>, vector<2x4xf32>,
    } else {
    }
    %c0 = arith.constant 0 : index
    %c0_1 = arith.constant 0 : index
    %3 = vector.load %arg8[%c0, %c0_1] : memref<2x4xf32, #tpu.memory_space<vmem>>, vector<2x4xf32>
    %c0_2 = arith.constant 0 : index
    %c0_3 = arith.constant 0 : index
    %c0_4 = arith.constant 0 : index
    %4 = vector.load %arg2[%c0_2, %c0_3, %c0_4] : memref<2x4x256xf32, #tpu.memory_space<vmem>>, vector<2x4x256xf32>
    %cst = arith.constant dense<0.000000e+00> : vector<2x4xf32>
    %5 = vector.multi_reduction <add>, %4, %cst [2] : vector<2x4x256xf32> to vector<2x4xf32>
    %6 = arith.addf %3, %5 : vector<2x4xf32>
    %c0_5 = arith.constant 0 : index
    %c0_6 = arith.constant 0 : index
    %7 = vector.load %arg8[%c0_5, %c0_6] : memref<2x4xf32, #tpu.memory_space<vmem>>, vector<2x4xf32>
    tpu.vector_store %arg8[%c0_5, %c0_6], %6 {strides = array<i32>} : memref<2x4xf32, #tpu.memory_space<vmem>>, vector<2x4xf32>,
    %c0_i32_7 = arith.constant 0 : i32
    %8 = arith.cmpi eq, %arg1, %c0_i32_7 : i32
    %9 = arith.extui %8 : i1 to i32
    %c0_i32_8 = arith.constant 0 : i32
    %10 = arith.cmpi ne, %9, %c0_i32_8 : i32
    scf.if %10 {
      %c0_9 = arith.constant 0 : index
      %c0_10 = arith.constant 0 : index
      %11 = vector.load %arg8[%c0_9, %c0_10] : memref<2x4xf32, #tpu.memory_space<vmem>>, vector<2x4xf32>
      %cst_11 = arith.constant 3.906250e-03 : f32
      %12 = vector.broadcast %cst_11 : f32 to vector<2x4xf32>
      %13 = arith.mulf %11, %12 : vector<2x4xf32>
      %c0_12 = arith.constant 0 : index
      %c0_13 = arith.constant 0 : index
      %14 = vector.load %arg3[%c0_12, %c0_13] : memref<4x16xf32, #tpu.memory_space<vmem>>, vector<4x16xf32>
      %cst_14 = arith.constant dense<0.000000e+00> : vector<2x16xf32>
      %15 = tpu.matmul %13, %14, %cst_14 {dimension_numbers = #tpu.dot_dimension_numbers<[1], [0], [0], [1], [0, 0, 1, 1], [], []>} : vector<2x4xf32>, vector<4x16xf32>, vector<2x16xf32> -> vector<2x16xf32>
      %c0_15 = arith.constant 0 : index
      %c0_16 = arith.constant 0 : index
      %16 = vector.load %arg4[%c0_15, %c0_16] : memref<1x16xf32, #tpu.memory_space<vmem>>, vector<1x16xf32>
      %17 = vector.broadcast %16 : vector<1x16xf32> to vector<2x16xf32>
      %18 = arith.addf %15, %17 : vector<2x16xf32>
      %19 = arith.negf %18 : vector<2x16xf32>
      %20 = math.exp %19 : vector<2x16xf32>
      %cst_17 = arith.constant 1.000000e+00 : f32
      %21 = vector.broadcast %cst_17 : f32 to vector<2x16xf32>
      %22 = arith.addf %21, %20 : vector<2x16xf32>
      %23 = arith.divf %21, %22 : vector<2x16xf32>
      %24 = arith.mulf %18, %23 : vector<2x16xf32>
      %c0_18 = arith.constant 0 : index
      %c0_19 = arith.constant 0 : index
      %25 = vector.load %arg5[%c0_18, %c0_19] : memref<16x4xf32, #tpu.memory_space<vmem>>, vector<16x4xf32>
      %cst_20 = arith.constant dense<0.000000e+00> : vector<2x4xf32>
      %26 = tpu.matmul %24, %25, %cst_20 {dimension_numbers = #tpu.dot_dimension_numbers<[1], [0], [0], [1], [0, 0, 1, 1], [], []>} : vector<2x16xf32>, vector<16x4xf32>, vector<2x4xf32> -> vector<2x4xf32>
      %c0_21 = arith.constant 0 : index
      %c0_22 = arith.constant 0 : index
      %27 = vector.load %arg6[%c0_21, %c0_22] : memref<1x4xf32, #tpu.memory_space<vmem>>, vector<1x4xf32>
      %28 = vector.broadcast %27 : vector<1x4xf32> to vector<2x4xf32>
      %29 = arith.addf %26, %28 : vector<2x4xf32>
      %30 = arith.negf %29 : vector<2x4xf32>
      %31 = math.exp %30 : vector<2x4xf32>
      %cst_23 = arith.constant 1.000000e+00 : f32
      %32 = vector.broadcast %cst_23 : f32 to vector<2x4xf32>
      %33 = arith.addf %32, %31 : vector<2x4xf32>
      %34 = arith.divf %32, %33 : vector<2x4xf32>
      %c0_24 = arith.constant 0 : index
      %c0_25 = arith.constant 0 : index
      %35 = vector.load %arg7[%c0_24, %c0_25] : memref<2x4xf32, #tpu.memory_space<vmem>>, vector<2x4xf32>
      tpu.vector_store %arg7[%c0_24, %c0_25], %34 {strides = array<i32>} : memref<2x4xf32, #tpu.memory_space<vmem>>, vector<2x4xf32>,
    } else {
    }
    return
  }
  func.func @transform_0(%arg0: i32, %arg1: i32) -> (i32, i32, i32) {
    %c0_i32 = arith.constant 0 : i32
    %c0_i32_0 = arith.constant 0 : i32
    return %arg0, %c0_i32, %arg1 : i32, i32, i32
  }
  func.func @transform_1(%arg0: i32, %arg1: i32) -> (i32, i32) {
    %c0_i32 = arith.constant 0 : i32
    %c0_i32_0 = arith.constant 0 : i32
    %c0_i32_1 = arith.constant 0 : i32
    return %c0_i32, %c0_i32_0 : i32, i32
  }
  func.func @transform_2(%arg0: i32, %arg1: i32) -> (i32, i32) {
    %c0_i32 = arith.constant 0 : i32
    %c0_i32_0 = arith.constant 0 : i32
    %c0_i32_1 = arith.constant 0 : i32
    return %c0_i32, %c0_i32_0 : i32, i32
  }
  func.func @transform_3(%arg0: i32, %arg1: i32) -> (i32, i32) {
    %c0_i32 = arith.constant 0 : i32
    %c0_i32_0 = arith.constant 0 : i32
    %c0_i32_1 = arith.constant 0 : i32
    return %c0_i32, %c0_i32_0 : i32, i32
  }
  func.func @transform_4(%arg0: i32, %arg1: i32) -> (i32, i32) {
    %c0_i32 = arith.constant 0 : i32
    %c0_i32_0 = arith.constant 0 : i32
    %c0_i32_1 = arith.constant 0 : i32
    return %c0_i32, %c0_i32_0 : i32, i32
  }
  func.func @transform_5(%arg0: i32, %arg1: i32) -> (i32, i32) {
    %c0_i32 = arith.constant 0 : i32
    %c0_i32_0 = arith.constant 0 : i32
    return %arg0, %c0_i32 : i32, i32
  }
}

</mosaic_0001>

<bundles_post_ra>
// kernel: tpu_custom_call.1
= control target key start
LH: loop header
LB: loop body
LE: loop exit
PB: predicated region body
PF: predicated region fallthrough
CT: control target
= control target key end

     0   :  { %vm36_vm0 = vcmask 1043456   ;;  %s390_s0 = inlined_call_operand.vmem [shape: f32[2,4,256], index: 0, kind: input, shape index: {}]   ;;  %s391_s1 = inlined_call_operand.vmem [shape: f32[4,16], index: 1, kind: input, shape index: {}]   ;;  %s392_s2 = inlined_call_operand.vmem [shape: f32[1,16], index: 2, kind: input, shape index: {}]   ;;  %s393_s3 = inlined_call_operand.vmem [shape: f32[16,4], index: 3, kind: input, shape index: {}]   ;;  %s394_s4 = inlined_call_operand.vmem [shape: f32[1,4], index: 4, kind: input, shape index: {}]   ;;  %s395_s5 = inlined_call_operand.hbm [shape: f32[2,4], index: 5, kind: output, shape index: {}]  }
   0x1   :  { %v28_v0 = vld [vmem:[%s390_s0] sm:$0xff]  ;;  %v29_v1 = vld [vmem:[%s390_s0 + $0x8] sm:$0xff] }
   0x2   :  { %10 = vsyncpa [#allocation4], 0  ;;  %v32_v2 = vcombine.high %v28_v0, %v28_v0  ;;  %v37_v3 = vsel %vm36_vm0, %v28_v0, 0.0  ;;  %v33_v4 = vcombine.high %v29_v1, %v29_v1  ;;  %v42_v6 = vsel %vm36_vm0, %v29_v1, 0.0  ;;  %v70_v11 = vld [vmem:[%s391_s1] sm:$0xf] }
   0x3   :  { %vm25_vm1 = vcmask 25600   ;;  %v325_v10 = vmov 0.0   ;;  %vm326_vm2 = vmmov 0   ;;  %v49_v12 = vlaneseq  ;;  %v163_v25 = vld [vmem:[%s393_s3 + $0x8] sm:$0xff]  ;;  %v162_v26 = vld [vmem:[%s393_s3] sm:$0xff] }
   0x4   :  { %v38_v5 = vsel %vm36_vm0, %v32_v2, 0.0  ;;  %v43_v7 = vsel %vm36_vm0, %v33_v4, 0.0  ;;  %26 = vst.msk [vmem:[#allocation2] sm:$0x3] %vm25_vm1, %v325_v10  ;;  %278 = vmatprep.subr.mxu0 %v325_v10  ;;  %283 = vmatprep.subr.mxu1 %v325_v10  ;;  %vm59_vm3 = vcmask 1041409   ;;  %vm78_vm4 = vcmask 31744  }
   0x5   :  { %v39_v8 = vadd.f32 %v38_v5, %v37_v3  ;;  %v44_v9 = vadd.f32 %v43_v7, %v42_v6  ;;  %279 = vmatpush3.msk.msra.mxu0 %vm36_vm0, %v70_v11  ;;  %280 = vmatprep.mubr.msk.f32.mxu0 %vm326_vm2, %v325_v10  ;;  %v50_v13 = vand.u32 127, %v49_v12  ;;  %v52_v14 = vshrl.u32 %v49_v12, 7  ;;  %v266_v27 = vld [vmem:[%s392_s2] ss:$0 sm:$0xff]  ;;  %s327_s2 = smov [#allocation3]  }
   0x6   :  { %287 = vmatprep.mubr.msk.f32.mxu1 %vm326_vm2, %v325_v10  ;;  %284 = vmatpush3.msra.mxu1 %v163_v25  ;;  %vm171_vm5 = vcmask 130048   ;;  %v270_v36 = vld [vmem:[%s394_s4] ss:$0 sm:$0xff]  ;;  %s258_s3 = sshll.u32 %s327_s2, 4  ;;  %s259_s3 = int_to_ptr.vmem [resolvable:$true] %s258_s3 }
   0x7   :  { %40 = vadd.xlane.f32.xlu0 %v39_v8  ;;  %v53_v16 = vsub.s32 %v50_v13, %v52_v14  ;;  %285 = vmatprep.subr.mxu1 %v325_v10  ;;  %s303_s30 = scalar_lea.vmem %s259_s3, 32  ;;  %p308_p1 = scmp.lt.s32.totalorder %s259_s3, %s259_s3 }
   0x8   :  { %286 = vmatpush3.msra.mxu1 %v162_v26  ;;  %p304_p0 = scmp.ne.s32.totalorder %s259_s3, %s303_s30  ;;  %p309_p2 = scmp.lt.s32.totalorder %s303_s30, %s303_s30 }
   0xa   :  { %p310_p3 = por %p309_p2, %p308_p1 }
   0xb   :  { %45 = vadd.xlane.f32.xlu0 %v44_v9  ;;  %v27_v19 = vld [vmem:[#allocation2] sm:$0x3] }
   0xc   :  { %p311_p4 = pnand %p310_p3, %p304_p0 }
  0x90   :  { %v41_v15 = vpop.xlane.xlu0 %40 }
  0x91   :  { %v54_v18 = vrot.slane %v41_v15, %v53_v16 }
  0x94   :  { %v46_v17 = vpop.xlane.xlu0 %45 }
  0x95   :  { %v58_v20 = vrot.slane %v46_v17, %v53_v16 }
  0x97   :  { %v60_v21 = vsel %vm59_vm3, %v58_v20, %v54_v18 }
  0x98   :  { %v62_v22 = vadd.f32 %v60_v21, %v27_v19 }
  0x9a   :  { %64 = vst.msk [vmem:[#allocation2] sm:$0x3] %vm25_vm1, %v62_v22 }
  0xa1   :  { %v68_v23 = vld [vmem:[#allocation2] sm:$0x3] }
  0xa2   :  { %v69_v24 = vmul.f32 0.00390625, %v68_v23 }
  0xa4   :  { %281 = vmatmul.mubr.msk.f32.vlgmr.msra.gmra.mxu0 %vm78_vm4, %v69_v24 }
 0x164   :  { %v151_v28 = vpop.f32.mrf.mxu0 }
 0x165   :  { %v152_v29 = vadd.f32 %v266_v27, %v151_v28 }
 0x166   :  { %v282_v30 = vpop.f32.mrf.mxu0 }
 0x167   :  { %v269_v31 = vmul.f32 -1.442695, %v152_v29 }
 0x169   :  { %295 = vpow2.f32 %v269_v31 }
 0x176   :  { %v296_v32 = vpop.eup %295 }
 0x177   :  { %v158_v33 = vadd.f32 1.0, %v296_v32 }
 0x179   :  { %297 = vrcp.f32 %v158_v33 }
 0x186   :  { %v298_v34 = vpop.eup %297 }
 0x187   :  { %v161_v35 = vmul.f32 %v298_v34, %v152_v29 }
 0x189   :  { %288 = vmatmul.mubr.msk.f32.vlgmr.msra.gmra.mxu1 %vm171_vm5, %v161_v35 }
 0x249   :  { %v241_v37 = vpop.f32.mrf.mxu1 }
 0x24a   :  { %v242_v38 = vadd.f32 %v270_v36, %v241_v37 }
 0x24b   :  { %v289_v39 = vpop.f32.mrf.mxu1 }
 0x24c   :  { %v272_v40 = vmul.f32 -1.442695, %v242_v38 }
 0x24e   :  { %299 = vpow2.f32 %v272_v40 }
 0x25b   :  { %v300_v41 = vpop.eup %299 }
 0x25c   :  { %v248_v42 = vadd.f32 1.0, %v300_v41 }
 0x25e   :  { %301 = vrcp.f32 %v248_v42 }
 0x26b   :  { %v302_v43 = vpop.eup %301 }
 0x26c   :  { %251 = vst.msk [vmem:[#allocation3] sm:$0x3] %vm25_vm1, %v302_v43 }
 0x26d   :  { %314 = shalt.err (!%p311_p4)
}
 0x26e   :  { %261 = dma.vmem_to_hbm [thread:$0]  %s259_s3, 32, %s395_s5, [#allocation4]  }
 0x26f   :  { %323 = dma.done.wait [#allocation4], 32  }
 0x270   :  { %324 = vsyncadd [#allocation4], 4294967264 }
 0x271   :  { %265 = vsyncpa [#allocation4], 1 }

</bundles_post_ra>
